<compile_context>
chip_gen: v6e
topology: v6e:2x2x1
jax: 0.10.0
libtpu: 0.0.40
codegen_flags: <defaults>
</compile_context>

<pallas_src>
import jax
import jax.numpy as jnp
from jax.experimental import pallas as pl
from jax.experimental.pallas import tpu as pltpu


BN_EPS = 1e-5
LEAKY_SLOPE = 0.2


def _round_up(x, m):
    return ((x + m - 1) // m) * m


# ---------------------------------------------------------------------------
# Pass 1: conv-as-matmul + per-tile BatchNorm partial statistics
# ---------------------------------------------------------------------------
def conv_stats_kernel(p_ref, w_ref, y_ref, sum_ref, sq_ref):
    # (TM, K) @ (K, C_pad) on the MXU, f32 accumulation.
    y = jnp.dot(p_ref[...], w_ref[...], preferred_element_type=jnp.float32)
    y_ref[...] = y
    # Per-channel partial sums for this M-tile (combined across tiles outside).
    sum_ref[...] = jnp.sum(y, axis=0, keepdims=True)[None]
    sq_ref[...] = jnp.sum(y * y, axis=0, keepdims=True)[None]


# ---------------------------------------------------------------------------
# Pass 2: normalize with folded per-channel scale / shift (one FMA / element)
# ---------------------------------------------------------------------------
def bn_apply_kernel(y_ref, scale_ref, shift_ref, o_ref):
    o_ref[...] = (y_ref[...] * scale_ref[...] + shift_ref[...]).astype(o_ref.dtype)


def _im2col_nchw(x_nchw, k, s, p):
    """Extract conv patches. Returns (M, C_in*k*k) with (C, kh, kw) inner order
    to match PyTorch's OIHW weight flattening."""
    N, C, H, W = x_nchw.shape
    H_out = (H + 2 * p - k) // s + 1
    W_out = (W + 2 * p - k) // s + 1
    x_pad = jnp.pad(x_nchw, ((0, 0), (0, 0), (p, p), (p, p)))
    x_pad = jnp.transpose(x_pad, (0, 2, 3, 1))  # (N, Hp, Wp, C)
    slabs = []
    for kh in range(k):
        for kw in range(k):
            slabs.append(x_pad[:, kh:kh + s * H_out:s, kw:kw + s * W_out:s, :])
    patches = jnp.stack(slabs, axis=3)                      # (N,Ho,Wo,k*k,C)
    patches = patches.reshape(N, H_out, W_out, k, k, C)
    patches = jnp.transpose(patches, (0, 1, 2, 5, 3, 4))    # inner (C, kh, kw)
    patches = patches.reshape(N * H_out * W_out, C * k * k)
    return patches, H_out, W_out


def down_block(x_nchw, weight_oihw, gamma, beta, *, k=4, s=2, p=1,
               matmul_dtype=jnp.bfloat16, tile_m=512):
    """Forward pass of DownBlock. x_nchw: (N, C_in, H, W). Returns NCHW f32."""
    N, C_in, H, W = x_nchw.shape
    C_out = weight_oihw.shape[0]

    # LeakyReLU once on the un-duplicated input (leaky_relu(0) == 0, so the
    # conv zero-padding is unaffected).
    x = x_nchw.astype(jnp.float32)
    x = jnp.where(x > 0, x, LEAKY_SLOPE * x)

    # TODO(synk): fold the im2col gather into pass 1 (k*k shifted matmuls over an
    # NHWC ref in pl.ANY memory space) to avoid materializing the duplicated
    # patches array in HBM.
    patches, H_out, W_out = _im2col_nchw(x, k, s, p)
    M, K = patches.shape

    # ---- TPU-friendly padding / tile sizing --------------------------------
    C_pad = _round_up(C_out, 128)                  # lane-dense output columns
    in_bytes = jnp.dtype(matmul_dtype).itemsize

    TM = min(tile_m, _round_up(M, 8))
    TM = max(8, _round_up(TM, 8))

    def _footprint(tm):                            # double-buffered VMEM bytes
        return (2 * tm * K * in_bytes              # streamed patches tile
                + 2 * K * C_pad * in_bytes         # resident weight
                + 2 * tm * C_pad * 4               # y tile (f32)
                + 4 * C_pad * 4)                   # per-tile stats

    while TM > 64 and _footprint(TM) > 40 * (1 << 20):   # keep v7x (64 MiB) safe
        TM = max(8, _round_up(TM // 2, 8))
    vmem_limit = int(min(max(2 * _footprint(TM), 16 * (1 << 20)), 48 * (1 << 20)))

    M_pad = _round_up(M, TM)
    MT = M_pad // TM

    # Zero-padded rows contribute nothing to sum/sumsq; we divide by the true M.
    patches = jnp.pad(patches, ((0, M_pad - M), (0, 0))).astype(matmul_dtype)
    # PyTorch weight (C_out, C_in, kh, kw) -> (K, C_pad), zero-padded columns.
    w_mat = weight_oihw.reshape(C_out, K).T.astype(jnp.float32)
    w_mat = jnp.pad(w_mat, ((0, 0), (0, C_pad - C_out))).astype(matmul_dtype)

    # ---- pass 1: tiled matmul + partial BN stats ---------------------------
    y, ysum, ysq = pl.pallas_call(
        conv_stats_kernel,
        out_shape=(
            jax.ShapeDtypeStruct((M_pad, C_pad), jnp.float32),
            jax.ShapeDtypeStruct((MT, 1, C_pad), jnp.float32),
            jax.ShapeDtypeStruct((MT, 1, C_pad), jnp.float32),
        ),
        grid_spec=pltpu.PrefetchScalarGridSpec(
            num_scalar_prefetch=0,
            grid=(MT,),
            in_specs=[
                pl.BlockSpec((TM, K), lambda i: (i, 0)),       # streamed over M
                pl.BlockSpec((K, C_pad), lambda i: (0, 0)),    # resident weight
            ],
            out_specs=[
                pl.BlockSpec((TM, C_pad), lambda i: (i, 0)),
                pl.BlockSpec((1, 1, C_pad), lambda i: (i, 0, 0)),
                pl.BlockSpec((1, 1, C_pad), lambda i: (i, 0, 0)),
            ],
        ),
        compiler_params=pltpu.CompilerParams(
            dimension_semantics=("parallel",),
            vmem_limit_bytes=vmem_limit),
        cost_estimate=pl.CostEstimate(
            flops=2 * M_pad * K * C_pad,
            transcendentals=0,
            bytes_accessed=(M_pad * K * in_bytes + K * C_pad * in_bytes
                            + M_pad * C_pad * 4)),
    )(patches, w_mat)

    # ---- finalize BN statistics (O(C) work, plain jnp) ----------------------
    total = jnp.sum(ysum[:, 0, :], axis=0)
    total_sq = jnp.sum(ysq[:, 0, :], axis=0)
    mean = total / M                                        # true (unpadded) M
    var = jnp.maximum(total_sq / M - mean * mean, 0.0)      # biased (training)
    inv = jax.lax.rsqrt(var + BN_EPS)                       # once per channel
    g = jnp.pad(gamma.astype(jnp.float32), (0, C_pad - C_out))
    b = jnp.pad(beta.astype(jnp.float32), (0, C_pad - C_out))
    scale = (g * inv).reshape(1, C_pad)
    shift = (b - mean * g * inv).reshape(1, C_pad)

    # ---- pass 2: normalize (one FMA per element) ----------------------------
    out_flat = pl.pallas_call(
        bn_apply_kernel,
        out_shape=jax.ShapeDtypeStruct((M_pad, C_pad), jnp.float32),
        grid_spec=pltpu.PrefetchScalarGridSpec(
            num_scalar_prefetch=0,
            grid=(MT,),
            in_specs=[
                pl.BlockSpec((TM, C_pad), lambda i: (i, 0)),
                pl.BlockSpec((1, C_pad), lambda i: (0, 0)),
                pl.BlockSpec((1, C_pad), lambda i: (0, 0)),
            ],
            out_specs=pl.BlockSpec((TM, C_pad), lambda i: (i, 0)),
        ),
        compiler_params=pltpu.CompilerParams(
            dimension_semantics=("parallel",),
            vmem_limit_bytes=vmem_limit),
        cost_estimate=pl.CostEstimate(
            flops=2 * M_pad * C_pad,
            transcendentals=0,
            bytes_accessed=2 * M_pad * C_pad * 4),
    )(y, scale, shift)

    # (M, C_out) -> (N, H_out, W_out, C_out) -> NCHW
    out = out_flat[:M, :C_out].reshape(N, H_out, W_out, C_out)
    return jnp.transpose(out, (0, 3, 1, 2))


def _reference(x_nchw, weight_oihw, gamma, beta, *, k=4, s=2, p=1):
    x = jnp.where(x_nchw > 0, x_nchw, LEAKY_SLOPE * x_nchw)
    y = jax.lax.conv_general_dilated(
        x.astype(jnp.float32), weight_oihw.astype(jnp.float32),
        window_strides=(s, s), padding=((p, p), (p, p)),
        dimension_numbers=("NCHW", "OIHW", "NCHW"))
    mean = jnp.mean(y, axis=(0, 2, 3), keepdims=True)
    var = jnp.mean((y - mean) ** 2, axis=(0, 2, 3), keepdims=True)
    inv = jax.lax.rsqrt(var + BN_EPS)
    return (y - mean) * inv * gamma.reshape(1, -1, 1, 1) + beta.reshape(1, -1, 1, 1)


if __name__ == "__main__":
    # Small shapes: batch=2, in_dim=4, out_dim=8, spatial=16 -> output 8x8
    N, C_in, C_out, H, W = 2, 4, 8, 16, 16
    k, s, p = 4, 2, 1

    key = jax.random.PRNGKey(0)
    kx, kw = jax.random.split(key)
    x = jax.random.normal(kx, (N, C_in, H, W), dtype=jnp.float32)
    # Deterministic parameter init (synthetic; matches Conv2d weight shape)
    weight = jax.random.normal(kw, (C_out, C_in, k, k), dtype=jnp.float32) * 0.1
    gamma = jnp.ones((C_out,), dtype=jnp.float32)    # BatchNorm2d default init
    beta = jnp.zeros((C_out,), dtype=jnp.float32)

    # f32-operand path (bit-accurate check) and the default bf16 MXU path.
    out_f32 = down_block(x, weight, gamma, beta, k=k, s=s, p=p,
                         matmul_dtype=jnp.float32)
    out_bf16 = down_block(x, weight, gamma, beta, k=k, s=s, p=p)
    out_f32, out_bf16 = jax.block_until_ready((out_f32, out_bf16))

    ref = _reference(x, weight, gamma, beta, k=k, s=s, p=p)
    assert out_f32.shape == (N, C_out, H // 2, W // 2), out_f32.shape
    assert jnp.allclose(out_f32, ref, atol=1e-4, rtol=1e-4), \
        float(jnp.max(jnp.abs(out_f32 - ref)))
    assert jnp.allclose(out_bf16, ref, atol=5e-2, rtol=5e-2), \
        float(jnp.max(jnp.abs(out_bf16 - ref)))

    print("KERNEL_OK")
</pallas_src>

<mosaic_0001>
module attributes {stable_mosaic.version = 11 : i64} {
  func.func @conv_stats_kernel(%arg0: i32, %arg1: memref<128x64xf32, #tpu.memory_space<vmem>>, %arg2: memref<64x128xf32, #tpu.memory_space<vmem>>, %arg3: memref<128x128xf32, #tpu.memory_space<vmem>>, %arg4: memref<1x1x128xf32, #tpu.memory_space<vmem>>, %arg5: memref<1x1x128xf32, #tpu.memory_space<vmem>>) attributes {dimension_semantics = [#tpu.dimension_semantics<parallel>], iteration_bounds = array<i64: 1>, scalar_prefetch = 0 : i64, scratch_operands = 0 : i64, tpu.core_type = #tpu.core_type<tc>, window_params = [{transform_indices = @transform_0, window_bounds = array<i64: 128, 64>}, {pipeline_mode = #tpu.pipeline_mode<synchronous>, transform_indices = @transform_1, window_bounds = array<i64: 64, 128>}, {transform_indices = @transform_2, window_bounds = array<i64: 128, 128>}, {transform_indices = @transform_3, window_bounds = array<i64: 1, 1, 128>}, {transform_indices = @transform_4, window_bounds = array<i64: 1, 1, 128>}]} {
    %c0 = arith.constant 0 : index
    %c0_0 = arith.constant 0 : index
    %0 = vector.load %arg1[%c0, %c0_0] : memref<128x64xf32, #tpu.memory_space<vmem>>, vector<128x64xf32>
    %c0_1 = arith.constant 0 : index
    %c0_2 = arith.constant 0 : index
    %1 = vector.load %arg2[%c0_1, %c0_2] : memref<64x128xf32, #tpu.memory_space<vmem>>, vector<64x128xf32>
    %cst = arith.constant dense<0.000000e+00> : vector<128x128xf32>
    %2 = tpu.matmul %0, %1, %cst {dimension_numbers = #tpu.dot_dimension_numbers<[1], [0], [0], [1], [0, 0, 1, 1], [], []>} : vector<128x64xf32>, vector<64x128xf32>, vector<128x128xf32> -> vector<128x128xf32>
    %c0_3 = arith.constant 0 : index
    %c0_4 = arith.constant 0 : index
    %3 = vector.load %arg3[%c0_3, %c0_4] : memref<128x128xf32, #tpu.memory_space<vmem>>, vector<128x128xf32>
    tpu.vector_store %arg3[%c0_3, %c0_4], %2 {strides = array<i32>} : memref<128x128xf32, #tpu.memory_space<vmem>>, vector<128x128xf32>,
    %cst_5 = arith.constant dense<0.000000e+00> : vector<128xf32>
    %4 = vector.multi_reduction <add>, %2, %cst_5 [0] : vector<128x128xf32> to vector<128xf32>
    %5 = vector.shape_cast %4 : vector<128xf32> to vector<1x128xf32>
    %6 = vector.shape_cast %5 : vector<1x128xf32> to vector<1x1x128xf32>
    %c0_6 = arith.constant 0 : index
    %c0_7 = arith.constant 0 : index
    %c0_8 = arith.constant 0 : index
    %7 = vector.load %arg4[%c0_6, %c0_7, %c0_8] : memref<1x1x128xf32, #tpu.memory_space<vmem>>, vector<1x1x128xf32>
    tpu.vector_store %arg4[%c0_6, %c0_7, %c0_8], %6 {strides = array<i32>} : memref<1x1x128xf32, #tpu.memory_space<vmem>>, vector<1x1x128xf32>,
    %8 = arith.mulf %2, %2 : vector<128x128xf32>
    %cst_9 = arith.constant dense<0.000000e+00> : vector<128xf32>
    %9 = vector.multi_reduction <add>, %8, %cst_9 [0] : vector<128x128xf32> to vector<128xf32>
    %10 = vector.shape_cast %9 : vector<128xf32> to vector<1x128xf32>
    %11 = vector.shape_cast %10 : vector<1x128xf32> to vector<1x1x128xf32>
    %c0_10 = arith.constant 0 : index
    %c0_11 = arith.constant 0 : index
    %c0_12 = arith.constant 0 : index
    %12 = vector.load %arg5[%c0_10, %c0_11, %c0_12] : memref<1x1x128xf32, #tpu.memory_space<vmem>>, vector<1x1x128xf32>
    tpu.vector_store %arg5[%c0_10, %c0_11, %c0_12], %11 {strides = array<i32>} : memref<1x1x128xf32, #tpu.memory_space<vmem>>, vector<1x1x128xf32>,
    return
  }
  func.func @transform_0(%arg0: i32) -> (i32, i32) {
    %c0_i32 = arith.constant 0 : i32
    %c0_i32_0 = arith.constant 0 : i32
    return %arg0, %c0_i32 : i32, i32
  }
  func.func @transform_1(%arg0: i32) -> (i32, i32) {
    %c0_i32 = arith.constant 0 : i32
    %c0_i32_0 = arith.constant 0 : i32
    %c0_i32_1 = arith.constant 0 : i32
    return %c0_i32, %c0_i32_0 : i32, i32
  }
  func.func @transform_2(%arg0: i32) -> (i32, i32) {
    %c0_i32 = arith.constant 0 : i32
    %c0_i32_0 = arith.constant 0 : i32
    return %arg0, %c0_i32 : i32, i32
  }
  func.func @transform_3(%arg0: i32) -> (i32, i32, i32) {
    %c0_i32 = arith.constant 0 : i32
    %c0_i32_0 = arith.constant 0 : i32
    %c0_i32_1 = arith.constant 0 : i32
    return %arg0, %c0_i32, %c0_i32_0 : i32, i32, i32
  }
  func.func @transform_4(%arg0: i32) -> (i32, i32, i32) {
    %c0_i32 = arith.constant 0 : i32
    %c0_i32_0 = arith.constant 0 : i32
    %c0_i32_1 = arith.constant 0 : i32
    return %arg0, %c0_i32, %c0_i32_0 : i32, i32, i32
  }
}

</mosaic_0001>

<bundles_post_ra>
// kernel: tpu_custom_call.1
= control target key start
LH: loop header
LB: loop body
LE: loop exit
PB: predicated region body
PF: predicated region fallthrough
CT: control target
= control target key end

     0   :  { %10 = vsyncpa [#allocation3], 0  ;;  %vm40_vm0 = vcmask 523264   ;;  %s657_s0 = inlined_call_operand.vmem [shape: f32[128,64], index: 0, kind: input, shape index: {}]   ;;  %s658_s1 = inlined_call_operand.vmem [shape: f32[64,128], index: 1, kind: input, shape index: {}]   ;;  %s659_s2 = inlined_call_operand.hbm [shape: f32[128,128], index: 2, kind: output, shape index: {0}]   ;;  %s660_s3 = inlined_call_operand.hbm [shape: f32[1,1,128], index: 3, kind: output, shape index: {1}]   ;;  %s661_s4 = inlined_call_operand.hbm [shape: f32[1,1,128], index: 4, kind: output, shape index: {2}]  }
   0x1   :  { %v39_v0 = vld [vmem:[%s658_s1 + $0x38] sm:$0xff]  ;;  %v38_v1 = vld [vmem:[%s658_s1 + $0x30] sm:$0xff]  ;;  %v37_v2 = vld [vmem:[%s658_s1 + $0x28] sm:$0xff] }
   0x2   :  { %393 = vmatprep.subr.mxu0 %v39_v0  ;;  %433 = vmatprep.subr.mxu1 %v39_v0  ;;  %v16_v3 = vld [vmem:[%s657_s0] sm:$0xff]  ;;  %v35_v5 = vld [vmem:[%s658_s1 + $0x18] sm:$0xff]  ;;  %v34_v6 = vld [vmem:[%s658_s1 + $0x10] sm:$0xff] }
   0x3   :  { %394 = vmatpush3.msra.mxu0 %v39_v0  ;;  %441 = vmatpush3.msra.mxu1 %v39_v0  ;;  %v36_v4 = vld [vmem:[%s658_s1 + $0x20] sm:$0xff] }
   0x4   :  { %395 = vmatprep.subr.mxu0 %v38_v1  ;;  %409 = vmatprep.mubr.msk.f32.mxu0 %vm40_vm0, %v16_v3 }
   0x5   :  { %396 = vmatpush3.msra.mxu0 %v38_v1  ;;  %434 = vmatprep.subr.mxu1 %v38_v1 }
   0x6   :  { %397 = vmatprep.subr.mxu0 %v37_v2  ;;  %442 = vmatpush3.msra.mxu1 %v38_v1 }
   0x7   :  { %398 = vmatpush3.msra.mxu0 %v37_v2  ;;  %435 = vmatprep.subr.mxu1 %v37_v2 }
   0x8   :  { %399 = vmatprep.subr.mxu0 %v36_v4  ;;  %443 = vmatpush3.msra.mxu1 %v37_v2 }
   0x9   :  { %400 = vmatpush3.msra.mxu0 %v36_v4  ;;  %436 = vmatprep.subr.mxu1 %v36_v4 }
   0xa   :  { %11 = vsyncpa [#allocation5], 0  ;;  %401 = vmatprep.subr.mxu0 %v35_v5  ;;  %444 = vmatpush3.msra.mxu1 %v36_v4  ;;  %v33_v7 = vld [vmem:[%s658_s1 + $0x8] sm:$0xff]  ;;  %v32_v8 = vld [vmem:[%s658_s1] sm:$0xff] }
   0xb   :  { %402 = vmatpush3.msra.mxu0 %v35_v5  ;;  %437 = vmatprep.subr.mxu1 %v35_v5  ;;  %v17_v9 = vld [vmem:[%s657_s0 + $0x8] sm:$0xff]  ;;  %v18_v10 = vld [vmem:[%s657_s0 + $0x10] sm:$0xff]  ;;  %v24_v11 = vld [vmem:[%s657_s0 + $0x40] sm:$0xff] }
   0xc   :  { %403 = vmatprep.subr.mxu0 %v34_v6  ;;  %445 = vmatpush3.msra.mxu1 %v35_v5  ;;  %v25_v12 = vld [vmem:[%s657_s0 + $0x48] sm:$0xff]  ;;  %v26_v13 = vld [vmem:[%s657_s0 + $0x50] sm:$0xff]  ;;  %v19_v14 = vld [vmem:[%s657_s0 + $0x18] sm:$0xff] }
   0xd   :  { %404 = vmatpush3.msra.mxu0 %v34_v6  ;;  %438 = vmatprep.subr.mxu1 %v34_v6  ;;  %v20_v15 = vld [vmem:[%s657_s0 + $0x20] sm:$0xff]  ;;  %v27_v16 = vld [vmem:[%s657_s0 + $0x58] sm:$0xff]  ;;  %v21_v18 = vld [vmem:[%s657_s0 + $0x28] sm:$0xff] }
   0xe   :  { %405 = vmatprep.subr.mxu0 %v33_v7  ;;  %446 = vmatpush3.msra.mxu1 %v34_v6  ;;  %v28_v17 = vld [vmem:[%s657_s0 + $0x60] sm:$0xff]  ;;  %v22_v19 = vld [vmem:[%s657_s0 + $0x30] sm:$0xff]  ;;  %v29_v20 = vld [vmem:[%s657_s0 + $0x68] sm:$0xff] }
   0xf   :  { %406 = vmatpush3.msra.mxu0 %v33_v7  ;;  %439 = vmatprep.subr.mxu1 %v33_v7  ;;  %v30_v21 = vld [vmem:[%s657_s0 + $0x70] sm:$0xff]  ;;  %v23_v22 = vld [vmem:[%s657_s0 + $0x38] sm:$0xff] }
  0x10   :  { %407 = vmatprep.subr.mxu0 %v32_v8  ;;  %447 = vmatpush3.msra.mxu1 %v33_v7  ;;  %v31_v23 = vld [vmem:[%s657_s0 + $0x78] sm:$0xff]  ;;  %s518_s0 = smov [#allocation2]  }
  0x11   :  { %408 = vmatpush3.msra.mxu0 %v32_v8  ;;  %440 = vmatprep.subr.mxu1 %v32_v8  ;;  %s315_s10 = sshll.u32 %s518_s0, 4  ;;  %s316_s10 = int_to_ptr.vmem [resolvable:$true] %s315_s10 }
  0x12   :  { %410 = vmatmul.mubr.msk.f32.vlgmr.msra.gmra.mxu0 %vm40_vm0, %v17_v9  ;;  %448 = vmatpush3.msra.mxu1 %v32_v8  ;;  %s454_s11 = scalar_lea.vmem %s316_s10, 2048  ;;  %p459_p1 = scmp.lt.s32.totalorder %s316_s10, %s316_s10 }
  0x13   :  { %412 = vmatprep.mubr.msk.f32.mxu0 %vm40_vm0, %v18_v10  ;;  %421 = vmatprep.mubr.msk.f32.mxu1 %vm40_vm0, %v24_v11  ;;  %p455_p0 = scmp.ne.s32.totalorder %s316_s10, %s454_s11  ;;  %p460_p2 = scmp.lt.s32.totalorder %s454_s11, %s454_s11 }
  0x14   :  { %422 = vmatmul.mubr.msk.f32.vlgmr.msra.gmra.mxu1 %vm40_vm0, %v25_v12 }
  0x15   :  { %424 = vmatprep.mubr.msk.f32.mxu1 %vm40_vm0, %v26_v13  ;;  %p461_p3 = por %p460_p2, %p459_p1 }
  0x16   :  { %413 = vmatmul.mubr.msk.f32.gmra.mxu0 %vm40_vm0, %v19_v14 }
  0x17   :  { %415 = vmatprep.mubr.msk.f32.mxu0 %vm40_vm0, %v20_v15  ;;  %p462_p4 = pnand %p461_p3, %p455_p0 }
  0x18   :  { %425 = vmatmul.mubr.msk.f32.gmra.mxu1 %vm40_vm0, %v27_v16 }
  0x19   :  { %427 = vmatprep.mubr.msk.f32.mxu1 %vm40_vm0, %v28_v17 }
  0x1a   :  { %416 = vmatmul.mubr.msk.f32.gmra.mxu0 %vm40_vm0, %v21_v18 }
  0x1b   :  { %418 = vmatprep.mubr.msk.f32.mxu0 %vm40_vm0, %v22_v19 }
  0x1c   :  { %428 = vmatmul.mubr.msk.f32.gmra.mxu1 %vm40_vm0, %v29_v20 }
  0x1d   :  { %430 = vmatprep.mubr.msk.f32.mxu1 %vm40_vm0, %v30_v21 }
  0x1e   :  { %419 = vmatmul.mubr.msk.f32.gmra.mxu0 %vm40_vm0, %v23_v22 }
  0x20   :  { %431 = vmatmul.mubr.msk.f32.gmra.mxu1 %vm40_vm0, %v31_v23 }
  0xd2   :  { %v411_v24 = vpop.f32.mrf.mxu0 }
  0xd3   :  { %235 = vst [vmem:[#allocation2 + $0x8] sm:$0xff] %v411_v24  ;;  %v273_v30 = vmul.f32 %v411_v24, %v411_v24 }
  0xd4   :  { %v155_v25 = vpop.f32.mrf.mxu0  ;;  %v636_v26 = vpop.f32.mrf.mxu1 }
  0xd5   :  { %234 = vst [vmem:[#allocation2] sm:$0xff] %v155_v25  ;;  %v272_v27 = vmul.f32 %v155_v25, %v155_v25  ;;  %243 = vst [vmem:[#allocation2 + $0x48] sm:$0xff] %v636_v26  ;;  %v250_v31 = vadd.f32 %v411_v24, %v155_v25 }
  0xd6   :  { %v414_v28 = vpop.f32.mrf.mxu0  ;;  %v195_v29 = vpop.f32.mrf.mxu1 }
  0xd7   :  { %237 = vst [vmem:[#allocation2 + $0x18] sm:$0xff] %v414_v28  ;;  %242 = vst [vmem:[#allocation2 + $0x40] sm:$0xff] %v195_v29  ;;  %v288_v34 = vadd.f32 %v273_v30, %v272_v27  ;;  %v275_v39 = vmul.f32 %v414_v28, %v414_v28 }
  0xd8   :  { %v165_v32 = vpop.f32.mrf.mxu0  ;;  %v639_v33 = vpop.f32.mrf.mxu1 }
  0xd9   :  { %236 = vst [vmem:[#allocation2 + $0x10] sm:$0xff] %v165_v32  ;;  %v251_v35 = vadd.f32 %v250_v31, %v165_v32  ;;  %v274_v36 = vmul.f32 %v165_v32, %v165_v32  ;;  %245 = vst [vmem:[#allocation2 + $0x58] sm:$0xff] %v639_v33 }
  0xda   :  { %v417_v37 = vpop.f32.mrf.mxu0  ;;  %v205_v38 = vpop.f32.mrf.mxu1 }
  0xdb   :  { %v289_v40 = vadd.f32 %v288_v34, %v274_v36  ;;  %239 = vst [vmem:[#allocation2 + $0x28] sm:$0xff] %v417_v37  ;;  %v252_v41 = vadd.f32 %v414_v28, %v251_v35  ;;  %244 = vst [vmem:[#allocation2 + $0x50] sm:$0xff] %v205_v38  ;;  %v277_v49 = vmul.f32 %v417_v37, %v417_v37 }
  0xdc   :  { %v175_v42 = vpop.f32.mrf.mxu0  ;;  %v429_v43 = vpop.f32.mrf.mxu1 }
  0xdd   :  { %238 = vst [vmem:[#allocation2 + $0x20] sm:$0xff] %v175_v42  ;;  %v253_v44 = vadd.f32 %v252_v41, %v175_v42  ;;  %v276_v45 = vmul.f32 %v175_v42, %v175_v42  ;;  %v290_v46 = vadd.f32 %v289_v40, %v275_v39  ;;  %247 = vst [vmem:[#allocation2 + $0x68] sm:$0xff] %v429_v43 }
  0xde   :  { %v420_v47 = vpop.f32.mrf.mxu0  ;;  %v215_v48 = vpop.f32.mrf.mxu1 }
  0xdf   :  { %v291_v50 = vadd.f32 %v290_v46, %v276_v45  ;;  %241 = vst [vmem:[#allocation2 + $0x38] sm:$0xff] %v420_v47  ;;  %v254_v51 = vadd.f32 %v417_v37, %v253_v44  ;;  %246 = vst [vmem:[#allocation2 + $0x60] sm:$0xff] %v215_v48  ;;  %v279_v58 = vmul.f32 %v420_v47, %v420_v47 }
  0xe0   :  { %v185_v52 = vpop.f32.mrf.mxu0  ;;  %v432_v53 = vpop.f32.mrf.mxu1 }
  0xe1   :  { %240 = vst [vmem:[#allocation2 + $0x30] sm:$0xff] %v185_v52  ;;  %v255_v54 = vadd.f32 %v254_v51, %v185_v52  ;;  %v278_v55 = vmul.f32 %v185_v52, %v185_v52  ;;  %v292_v56 = vadd.f32 %v291_v50, %v277_v49  ;;  %249 = vst [vmem:[#allocation2 + $0x78] sm:$0xff] %v432_v53 }
  0xe2   :  { %v225_v57 = vpop.f32.mrf.mxu1 }
  0xe3   :  { %v256_v59 = vadd.f32 %v420_v47, %v255_v54  ;;  %v293_v60 = vadd.f32 %v292_v56, %v278_v55  ;;  %248 = vst [vmem:[#allocation2 + $0x70] sm:$0xff] %v225_v57 }
  0xe4   :  { %465 = shalt.err (!%p462_p4)
}
  0xe5   :  { %s519_s12 = smov 128   ;;  %s520_s1 = smov 8   ;;  %v294_v61 = vadd.f32 %v293_v60, %v279_v58  ;;  %v257_v62 = vadd.f32 %v256_v59, %v195_v29  ;;  %v280_v63 = vmul.f32 %v195_v29, %v195_v29  ;;  %v281_v0 = vmul.f32 %v636_v26, %v636_v26 }
  0xe6   :  { %321 = dma.vmem_to_hbm [thread:$0]  %s316_s10, 2048, %s659_s2, [#allocation3], %s519_s12, %s519_s12, %s520_s1   ;;  %v282_v4 = vmul.f32 %v205_v38, %v205_v38  ;;  %v283_v6 = vmul.f32 %v639_v33, %v639_v33  ;;  %v284_v10 = vmul.f32 %v215_v48, %v215_v48  ;;  %v285_v12 = vmul.f32 %v429_v43, %v429_v43 }
  0xe7   :  { %v295_v1 = vadd.f32 %v294_v61, %v280_v63  ;;  %v258_v2 = vadd.f32 %v636_v26, %v257_v62  ;;  %v286_v16 = vmul.f32 %v225_v57, %v225_v57  ;;  %v287_v18 = vmul.f32 %v432_v53, %v432_v53  ;;  %s521_s2 = smov [#allocation4]   ;;  %s522_s16 = smov [#allocation6]  }
  0xe8   :  { %s328_s15 = sshll.u32 %s521_s2, 4  ;;  %s338_s17 = sshll.u32 %s522_s16, 4  ;;  %s329_s15 = int_to_ptr.vmem [resolvable:$true] %s328_s15  ;;  %s339_s17 = int_to_ptr.vmem [resolvable:$true] %s338_s17 }
  0xe9   :  { %v259_v3 = vadd.f32 %v258_v2, %v205_v38  ;;  %v296_v5 = vadd.f32 %v295_v1, %v281_v0  ;;  %s474_s18 = scalar_lea.vmem %s329_s15, 16  ;;  %s478_s19 = scalar_lea.vmem %s329_s15, 32 }
  0xea   :  { %p475_p5 = scmp.ne.s32.totalorder %s329_s15, %s474_s18  ;;  %p479_p6 = scmp.lt.s32.totalorder %s329_s15, %s329_s15 }
  0xeb   :  { %v297_v7 = vadd.f32 %v296_v5, %v282_v4  ;;  %v260_v8 = vadd.f32 %v639_v33, %v259_v3  ;;  %p480_p7 = scmp.lt.s32.totalorder %s478_s19, %s474_s18 }
  0xed   :  { %v261_v9 = vadd.f32 %v260_v8, %v215_v48  ;;  %v298_v11 = vadd.f32 %v297_v7, %v283_v6  ;;  %p481_p8 = por %p480_p7, %p479_p6 }
  0xef   :  { %v299_v13 = vadd.f32 %v298_v11, %v284_v10  ;;  %v262_v14 = vadd.f32 %v429_v43, %v261_v9  ;;  %p482_p9 = pnand %p481_p8, %p475_p5 }
  0xf1   :  { %v263_v15 = vadd.f32 %v262_v14, %v225_v57  ;;  %v300_v17 = vadd.f32 %v299_v13, %v285_v12 }
  0xf3   :  { %v264_v19 = vadd.f32 %v432_v53, %v263_v15  ;;  %v301_v20 = vadd.f32 %v300_v17, %v286_v16 }
  0xf5   :  { %v265_v21 = vrot.slane %v264_v19, 4  ;;  %v302_v22 = vadd.f32 %v301_v20, %v287_v18 }
  0xf7   :  { %v266_v23 = vadd.f32 %v265_v21, %v264_v19  ;;  %v303_v24 = vrot.slane %v302_v22, 4 }
  0xf9   :  { %v267_v25 = vrot.slane %v266_v23, 2  ;;  %v304_v26 = vadd.f32 %v303_v24, %v302_v22 }
  0xfb   :  { %v268_v27 = vadd.f32 %v267_v25, %v266_v23  ;;  %v305_v28 = vrot.slane %v304_v26, 2 }
  0xfd   :  { %v269_v29 = vrot.slane %v268_v27, 1  ;;  %v306_v30 = vadd.f32 %v305_v28, %v304_v26 }
  0xff   :  { %v270_v31 = vadd.f32 %v269_v29, %v268_v27  ;;  %v307_v32 = vrot.slane %v306_v30, 1 }
 0x101   :  { %271 = vst [vmem:[#allocation4] sm:$0x1] %v270_v31  ;;  %v308_v33 = vadd.f32 %v307_v32, %v306_v30 }
 0x102   :  { %485 = shalt.err (!%p482_p9)
}
 0x103   :  { %331 = dma.vmem_to_hbm [thread:$0]  %s329_s15, 16, %s660_s3, [#allocation5]   ;;  %309 = vst [vmem:[#allocation6] sm:$0x1] %v308_v33 }
 0x104   :  { %s494_s22 = scalar_lea.vmem %s339_s17, 16  ;;  %s498_s23 = scalar_lea.vmem %s339_s17, 32 }
 0x105   :  { %p495_p10 = scmp.ne.s32.totalorder %s339_s17, %s494_s22  ;;  %p499_p11 = scmp.lt.s32.totalorder %s339_s17, %s339_s17 }
 0x106   :  { %p500_p12 = scmp.lt.s32.totalorder %s498_s23, %s494_s22 }
 0x108   :  { %p501_p13 = por %p500_p12, %p499_p11 }
 0x10a   :  { %p502_p0 = pnand %p501_p13, %p495_p10 }
 0x10c   :  { %505 = shalt.err (!%p502_p0)
}
 0x10d   :  { %341 = dma.vmem_to_hbm [thread:$0]  %s339_s17, 16, %s661_s4, [#allocation5]  }
 0x10e   :  { %514 = dma.done.wait [#allocation3], 2048  }
 0x10f   :  { %515 = vsyncadd [#allocation3], 4294965248 }
 0x110   :  { %516 = dma.done.wait [#allocation5], 32  }
 0x111   :  { %517 = vsyncadd [#allocation5], 4294967264 }
 0x112   :  { %351 = vsyncpa [#allocation3], 1 }
 0x113   :  { %352 = vsyncpa [#allocation5], 1 }

</bundles_post_ra>
